<compile_context>
chip_gen: v7x
topology: tpu7x:2x2x1
jax: 0.10.0
libtpu: 0.0.40
codegen_flags: <defaults>
</compile_context>

<pallas_src>
import jax
import jax.numpy as jnp
import numpy as np
from jax.experimental import pallas as pl
from jax.experimental.pallas import tpu as pltpu

_WEIGHT_BUFFERS = 2  # BlockSpec default double-buffering (counted in the VMEM budget).


# ----------------------------------------------------------------------------- kernels
def _lstm_cell_kernel(x_ref, h_ref, c_ref, wx_ref, wh_ref, b_ref, ht_ref, ct_ref):
    tH = ct_ref.shape[-1]
    # bf16 MXU inputs, f32 accumulation; all gate math stays in f32 (v5e-safe).
    x = x_ref[...].astype(wx_ref.dtype)
    h = h_ref[...].astype(wh_ref.dtype)
    z = (jnp.dot(x, wx_ref[...], preferred_element_type=jnp.float32)
         + jnp.dot(h, wh_ref[...], preferred_element_type=jnp.float32)
         + b_ref[...])
    # z lane layout (per hidden tile): [ f | i | o | C ], each tH wide.
    # sigmoid(v) = 0.5*tanh(0.5*v) + 0.5  -> one EUP pass over the 3 sigmoid gates.
    sig = 0.5 * jnp.tanh(0.5 * z[:, :3 * tH]) + 0.5
    ft = sig[:, 0 * tH:1 * tH]
    it = sig[:, 1 * tH:2 * tH]
    ot = sig[:, 2 * tH:3 * tH]
    ct_hat = jnp.tanh(z[:, 3 * tH:])
    c_prev = c_ref[...].astype(jnp.float32)
    ct = ft * c_prev + it + ct_hat     # "+ it" (not it*ct_hat): matches the reference module
    ht = ot * jnp.tanh(ct)
    ht_ref[...] = ht.astype(ht_ref.dtype)
    ct_ref[...] = ct.astype(ct_ref.dtype)


def _lstm_cell_zero_state_kernel(x_ref, wx_ref, b_ref, ht_ref, ct_ref):
    """hx=None fast path: c_prev == 0 and h_prev == 0, so skip Wh matmul and ft*c_prev."""
    tH = ct_ref.shape[-1]
    x = x_ref[...].astype(wx_ref.dtype)
    z = jnp.dot(x, wx_ref[...], preferred_element_type=jnp.float32) + b_ref[...]
    # z lane layout (per tile): [ f | i | o | C ].  ft is irrelevant (c_prev == 0).
    sig = 0.5 * jnp.tanh(0.5 * z[:, 1 * tH:3 * tH]) + 0.5   # [ i | o ]
    it = sig[:, :tH]
    ot = sig[:, tH:]
    ct_hat = jnp.tanh(z[:, 3 * tH:])
    ct = it + ct_hat                    # reference: ft*0 + it + ct_hat
    ht = ot * jnp.tanh(ct)
    ht_ref[...] = ht.astype(ht_ref.dtype)
    ct_ref[...] = ct.astype(ct_ref.dtype)


# ----------------------------------------------------------------------------- tiling helpers
def _vmem_budget_bytes():
    """~70% of physical VMEM (fallback 64 MiB if the query is unavailable)."""
    phys = 64 * 1024 * 1024
    try:
        info = pltpu.get_tpu_info()
        for name in ("vmem_capacity_bytes", "vmem_size_bytes", "vmem_bytes"):
            v = getattr(info, name, None)
            if v:
                phys = int(v)
                break
    except Exception:
        pass
    return int(phys * 0.7)


def _pick_hidden_tile(H, D, w_itemsize, budget):
    """Largest hidden tile whose (double-buffered) weight block fits in ~half the budget."""
    weight_budget = budget // 2

    def wbytes(tH):
        return _WEIGHT_BUFFERS * (D * 4 * tH * w_itemsize + 4 * tH * 4)

    if wbytes(H) <= weight_budget or H % 128 != 0:
        return H            # whole hidden dim fits, or can't tile on a 128-lane boundary
    for tH in range(H - 128, 0, -128):
        if H % tH == 0 and wbytes(tH) <= weight_budget:
            return tH
    return 128


def _pick_batch_tile(B, I, H, tH, x_itemsize, w_itemsize, budget):
    """VMEM-aware batch tile: weights(x2 buffers) + double-buffered tiles + f32 temporaries."""
    weight_bytes = _WEIGHT_BUFFERS * ((I + H) * 4 * tH * w_itemsize + 4 * tH * 4)
    left = max(budget - weight_bytes, 2 * 1024 * 1024)

    def tile_bytes(tb):
        per = (tb * I * x_itemsize        # x tile
               + tb * H * x_itemsize      # h_prev tile
               + tb * tH * 4              # c_prev tile
               + tb * tH * x_itemsize     # ht out tile
               + tb * tH * 4)             # ct out tile (f32)
        return 2 * per + 2 * tb * 4 * tH * 4   # double-buffered tiles + f32 gate temporaries

    tb = None
    for t in (1024, 512, 256, 128, 64, 32, 16, 8):   # 256-multiples first (v6e MXU M)
        if t <= B and tile_bytes(t) <= left:
            tb = t
            break
    if tb is None:
        tb = B if B < 8 else 8
    if B < 8:
        return B            # block must equal the full dim when < sublane granularity
    # Prefer >= 2 total grid steps so v7x's 2nd TensorCore and the DMA pipeline have work.
    if (H // tH) * pl.cdiv(B, tb) < 2 and B > 8:
        half = (B + 1) // 2
        tb = max(8, ((half + 7) // 8) * 8)
    return tb


# ----------------------------------------------------------------------------- params
def fuse_params(params, input_size, h_tile=None, weight_dtype=jnp.bfloat16):
    """Fuse the 4 per-gate Linear layers ONCE into a lane-dense weight.

    Lane layout (per hidden tile of width h_tile):  [ W_f | W_i | W_o | W_C ]
      * three sigmoid gates contiguous (one EUP slab), tanh gate last;
      * hidden-tile-major ordering so an H-tiled grid slices a contiguous
        (D, 4*h_tile) weight block per grid step.
    Weights stored in bf16 (MXU input precision); bias stays f32 (added to the
    f32 accumulator inside the kernel).
    """
    W = jnp.stack(
        [params["W_f"], params["W_i"], params["W_o"], params["W_C"]], axis=1)   # (D, 4, H)
    b = jnp.stack(
        [params["b_f"][0], params["b_i"][0], params["b_o"][0], params["b_C"][0]],
        axis=0)                                                                  # (4, H)
    D, _, H = W.shape
    w_itemsize = np.dtype(weight_dtype).itemsize
    if h_tile is None:
        h_tile = _pick_hidden_tile(H, D, w_itemsize, _vmem_budget_bytes())
    assert H % h_tile == 0, "h_tile must divide hidden_size"
    nT = H // h_tile
    W = W.reshape(D, 4, nT, h_tile).transpose(0, 2, 1, 3).reshape(D, 4 * H)
    b = b.reshape(4, nT, h_tile).transpose(1, 0, 2).reshape(1, 4 * H)
    return {
        "Wx": W[:input_size].astype(weight_dtype),
        "Wh": W[input_size:].astype(weight_dtype),
        "b": b.astype(jnp.float32),
        "h_tile": int(h_tile),
        "hidden": int(H),
        "input": int(input_size),
    }


def init_params(key, input_size, hidden_size, dtype=jnp.float32):
    D = input_size + hidden_size
    ks = jax.random.split(key, 8)
    bound = 1.0 / jnp.sqrt(D)  # matches nn.Linear default init range
    names = ["f", "i", "C", "o"]
    params = {}
    for idx, n in enumerate(names):
        params[f"W_{n}"] = jax.random.uniform(
            ks[2 * idx], (D, hidden_size), dtype, minval=-bound, maxval=bound)
        params[f"b_{n}"] = jax.random.uniform(
            ks[2 * idx + 1], (1, hidden_size), dtype, minval=-bound, maxval=bound)
    return params


# ----------------------------------------------------------------------------- wrapper
def lstm_cell(x, fused, hx=None):
    """One LSTMcell forward step.

    x: (B, input_size);  fused: output of fuse_params();  hx: optional (h_prev, c_prev).
    Returns (ht, ct): ht in x.dtype, ct in float32 (drift-safe cell state).
    """
    Wx, Wh, b = fused["Wx"], fused["Wh"], fused["b"]
    tH, I, H = fused["h_tile"], fused["input"], fused["hidden"]
    B = x.shape[0]
    assert x.shape[1] == I
    nT = H // tH

    budget = _vmem_budget_bytes()
    tb = _pick_batch_tile(B, I, H, tH, x.dtype.itemsize, Wx.dtype.itemsize, budget)
    nB = pl.cdiv(B, tb)
    # H-tile axis OUTER: the weight block index is constant across inner batch steps,
    # so each (D, 4*tH) weight slab is DMA'd once and stays VMEM-resident.
    grid = (nT, nB)

    out_shape = (jax.ShapeDtypeStruct((B, H), x.dtype),      # ht
                 jax.ShapeDtypeStruct((B, H), jnp.float32))   # ct
    out_specs = (pl.BlockSpec((tb, tH), lambda j, i: (i, j)),
                 pl.BlockSpec((tb, tH), lambda j, i: (i, j)))
    compiler_params = pltpu.CompilerParams(
        dimension_semantics=("parallel", "parallel"),
        vmem_limit_bytes=budget)

    if hx is None:
        cost = pl.CostEstimate(
            flops=int(2 * B * I * 4 * H + 8 * B * H),
            transcendentals=int(4 * B * H),
            bytes_accessed=int(B * I * x.dtype.itemsize
                               + I * 4 * H * Wx.dtype.itemsize + 4 * H * 4
                               + B * H * (x.dtype.itemsize + 4)),
        )
        return pl.pallas_call(
            _lstm_cell_zero_state_kernel,
            out_shape=out_shape,
            grid_spec=pltpu.PrefetchScalarGridSpec(
                num_scalar_prefetch=0,
                grid=grid,
                in_specs=[
                    pl.BlockSpec((tb, I), lambda j, i: (i, 0)),       # x tile
                    pl.BlockSpec((I, 4 * tH), lambda j, i: (0, j)),   # Wx (resident per j)
                    pl.BlockSpec((1, 4 * tH), lambda j, i: (0, j)),   # bias
                ],
                out_specs=out_specs),
            compiler_params=compiler_params,
            cost_estimate=cost,
        )(x, Wx, b)

    h_prev, c_prev = hx
    cost = pl.CostEstimate(
        flops=int(2 * B * (I + H) * 4 * H + 12 * B * H),
        transcendentals=int(5 * B * H),
        bytes_accessed=int(B * I * x.dtype.itemsize
                           + B * H * h_prev.dtype.itemsize
                           + B * H * c_prev.dtype.itemsize
                           + (I + H) * 4 * H * Wx.dtype.itemsize + 4 * H * 4
                           + B * H * (x.dtype.itemsize + 4)),
    )
    return pl.pallas_call(
        _lstm_cell_kernel,
        out_shape=out_shape,
        grid_spec=pltpu.PrefetchScalarGridSpec(
            num_scalar_prefetch=0,
            grid=grid,
            in_specs=[
                pl.BlockSpec((tb, I), lambda j, i: (i, 0)),        # x tile
                pl.BlockSpec((tb, H), lambda j, i: (i, 0)),        # h_prev tile (full H)
                pl.BlockSpec((tb, tH), lambda j, i: (i, j)),       # c_prev tile
                pl.BlockSpec((I, 4 * tH), lambda j, i: (0, j)),    # Wx (resident per j)
                pl.BlockSpec((H, 4 * tH), lambda j, i: (0, j)),    # Wh (resident per j)
                pl.BlockSpec((1, 4 * tH), lambda j, i: (0, j)),    # bias
            ],
            out_specs=out_specs),
        compiler_params=compiler_params,
        cost_estimate=cost,
    )(x, h_prev, c_prev, Wx, Wh, b)


# ----------------------------------------------------------------------------- reference
def _reference(x, params, hx=None, matmul_dtype=None):
    """Pure-JAX mirror of the PyTorch module.  matmul_dtype=jnp.bfloat16 emulates the
    kernel's MXU input precision (with f32 accumulation) for a tight comparison."""
    B = x.shape[0]
    H = params["W_f"].shape[1]
    if hx is None:
        h_prev = jnp.zeros((B, H), dtype=x.dtype)
        c_prev = jnp.zeros((B, H), dtype=x.dtype)
    else:
        h_prev, c_prev = hx
    xh = jnp.concatenate([x, h_prev], axis=-1)

    def lin(W, bias):
        if matmul_dtype is None:
            return xh @ W + bias
        return (jnp.dot(xh.astype(matmul_dtype), W.astype(matmul_dtype),
                        preferred_element_type=jnp.float32)
                + bias.astype(jnp.float32))

    ft = jax.nn.sigmoid(lin(params["W_f"], params["b_f"]))
    it = jax.nn.sigmoid(lin(params["W_i"], params["b_i"]))
    ct_hat = jnp.tanh(lin(params["W_C"], params["b_C"]))
    ct = ft * c_prev + it + ct_hat
    ot = jax.nn.sigmoid(lin(params["W_o"], params["b_o"]))
    ht = ot * jnp.tanh(ct)
    return ht, ct


# ----------------------------------------------------------------------------- self-test
if __name__ == "__main__":
    key = jax.random.PRNGKey(0)
    k_p, k_x, k_h, k_c = jax.random.split(key, 4)

    batch, input_size, hidden_size = 8, 16, 32
    params = init_params(k_p, input_size, hidden_size)
    fused = fuse_params(params, input_size)   # one-time: bf16 [f|i|o|C] fused weights
    x = jax.random.normal(k_x, (batch, input_size), jnp.float32)
    h0 = jax.random.normal(k_h, (batch, hidden_size), jnp.float32)
    c0 = jax.random.normal(k_c, (batch, hidden_size), jnp.float32)

    # --- case 1: hx=None (zero-state fast-path kernel) ---
    ht, ct = lstm_cell(x, fused)
    jax.block_until_ready((ht, ct))
    ht_f32, ct_f32 = _reference(x, params)                              # faithful f32 module
    ht_emu, ct_emu = _reference(x, params, matmul_dtype=jnp.bfloat16)   # MXU-precision mirror
    assert jnp.allclose(ht, ht_emu, rtol=1e-3, atol=2e-3), "ht mismatch vs bf16 ref (hx=None)"
    assert jnp.allclose(ct, ct_emu, rtol=1e-3, atol=2e-3), "ct mismatch vs bf16 ref (hx=None)"
    assert jnp.allclose(ht, ht_f32, rtol=0.0, atol=5e-2), "ht drift vs f32 ref (hx=None)"
    assert jnp.allclose(ct, ct_f32, rtol=0.0, atol=5e-2), "ct drift vs f32 ref (hx=None)"

    # --- case 2: explicit (h0, c0) ---
    ht2, ct2 = lstm_cell(x, fused, hx=(h0, c0))
    jax.block_until_ready((ht2, ct2))
    ht2_f32, ct2_f32 = _reference(x, params, hx=(h0, c0))
    ht2_emu, ct2_emu = _reference(x, params, hx=(h0, c0), matmul_dtype=jnp.bfloat16)
    assert jnp.allclose(ht2, ht2_emu, rtol=1e-3, atol=2e-3), "ht mismatch vs bf16 ref"
    assert jnp.allclose(ct2, ct2_emu, rtol=1e-3, atol=2e-3), "ct mismatch vs bf16 ref"
    assert jnp.allclose(ht2, ht2_f32, rtol=0.0, atol=5e-2), "ht drift vs f32 ref"
    assert jnp.allclose(ct2, ct2_f32, rtol=0.0, atol=5e-2), "ct drift vs f32 ref"

    print("KERNEL_OK")
</pallas_src>

<mosaic_0001>
module attributes {stable_mosaic.version = 11 : i64} {
  func.func @_lstm_cell_zero_state_kernel(%arg0: i32, %arg1: i32, %arg2: memref<8x16xf32, #tpu.memory_space<vmem>>, %arg3: memref<16x128xbf16, #tpu.memory_space<vmem>>, %arg4: memref<1x128xf32, #tpu.memory_space<vmem>>, %arg5: memref<8x32xf32, #tpu.memory_space<vmem>>, %arg6: memref<8x32xf32, #tpu.memory_space<vmem>>) attributes {dimension_semantics = [#tpu.dimension_semantics<parallel>, #tpu.dimension_semantics<parallel>], iteration_bounds = array<i64: 1, 1>, scalar_prefetch = 0 : i64, scratch_operands = 0 : i64, tpu.core_type = #tpu.core_type<tc>, window_params = [{transform_indices = @transform_0, window_bounds = array<i64: 8, 16>}, {transform_indices = @transform_1, window_bounds = array<i64: 16, 128>}, {transform_indices = @transform_2, window_bounds = array<i64: 1, 128>}, {transform_indices = @transform_3, window_bounds = array<i64: 8, 32>}, {transform_indices = @transform_4, window_bounds = array<i64: 8, 32>}]} {
    %c0 = arith.constant 0 : index
    %c0_0 = arith.constant 0 : index
    %0 = vector.load %arg2[%c0, %c0_0] : memref<8x16xf32, #tpu.memory_space<vmem>>, vector<8x16xf32>
    %1 = arith.truncf %0 : vector<8x16xf32> to vector<8x16xbf16>
    %c0_1 = arith.constant 0 : index
    %c0_2 = arith.constant 0 : index
    %2 = vector.load %arg3[%c0_1, %c0_2] : memref<16x128xbf16, #tpu.memory_space<vmem>>, vector<16x128xbf16>
    %cst = arith.constant dense<0.000000e+00> : vector<8x128xf32>
    %3 = tpu.matmul %1, %2, %cst {dimension_numbers = #tpu.dot_dimension_numbers<[1], [0], [0], [1], [0, 0, 1, 1], [], []>} : vector<8x16xbf16>, vector<16x128xbf16>, vector<8x128xf32> -> vector<8x128xf32>
    %c0_3 = arith.constant 0 : index
    %c0_4 = arith.constant 0 : index
    %4 = vector.load %arg4[%c0_3, %c0_4] : memref<1x128xf32, #tpu.memory_space<vmem>>, vector<1x128xf32>
    %5 = vector.broadcast %4 : vector<1x128xf32> to vector<8x128xf32>
    %6 = arith.addf %3, %5 : vector<8x128xf32>
    %7 = vector.extract_strided_slice %6 {offsets = [0, 32], sizes = [8, 64], strides = [1, 1]} : vector<8x128xf32> to vector<8x64xf32>
    %cst_5 = arith.constant 5.000000e-01 : f32
    %8 = vector.broadcast %cst_5 : f32 to vector<8x64xf32>
    %9 = arith.mulf %8, %7 : vector<8x64xf32>
    %10 = math.tanh %9 : vector<8x64xf32>
    %cst_6 = arith.constant 5.000000e-01 : f32
    %11 = vector.broadcast %cst_6 : f32 to vector<8x64xf32>
    %12 = arith.mulf %11, %10 : vector<8x64xf32>
    %cst_7 = arith.constant 5.000000e-01 : f32
    %13 = vector.broadcast %cst_7 : f32 to vector<8x64xf32>
    %14 = arith.addf %12, %13 : vector<8x64xf32>
    %15 = vector.extract_strided_slice %14 {offsets = [0, 0], sizes = [8, 32], strides = [1, 1]} : vector<8x64xf32> to vector<8x32xf32>
    %16 = vector.extract_strided_slice %14 {offsets = [0, 32], sizes = [8, 32], strides = [1, 1]} : vector<8x64xf32> to vector<8x32xf32>
    %17 = vector.extract_strided_slice %6 {offsets = [0, 96], sizes = [8, 32], strides = [1, 1]} : vector<8x128xf32> to vector<8x32xf32>
    %18 = math.tanh %17 : vector<8x32xf32>
    %19 = arith.addf %15, %18 : vector<8x32xf32>
    %20 = math.tanh %19 : vector<8x32xf32>
    %21 = arith.mulf %16, %20 : vector<8x32xf32>
    %c0_8 = arith.constant 0 : index
    %c0_9 = arith.constant 0 : index
    %22 = vector.load %arg5[%c0_8, %c0_9] : memref<8x32xf32, #tpu.memory_space<vmem>>, vector<8x32xf32>
    tpu.vector_store %arg5[%c0_8, %c0_9], %21 {strides = array<i32>} : memref<8x32xf32, #tpu.memory_space<vmem>>, vector<8x32xf32>,
    %c0_10 = arith.constant 0 : index
    %c0_11 = arith.constant 0 : index
    %23 = vector.load %arg6[%c0_10, %c0_11] : memref<8x32xf32, #tpu.memory_space<vmem>>, vector<8x32xf32>
    tpu.vector_store %arg6[%c0_10, %c0_11], %19 {strides = array<i32>} : memref<8x32xf32, #tpu.memory_space<vmem>>, vector<8x32xf32>,
    return
  }
  func.func @transform_0(%arg0: i32, %arg1: i32) -> (i32, i32) {
    %c0_i32 = arith.constant 0 : i32
    %c0_i32_0 = arith.constant 0 : i32
    return %arg1, %c0_i32 : i32, i32
  }
  func.func @transform_1(%arg0: i32, %arg1: i32) -> (i32, i32) {
    %c0_i32 = arith.constant 0 : i32
    %c0_i32_0 = arith.constant 0 : i32
    return %c0_i32, %arg0 : i32, i32
  }
  func.func @transform_2(%arg0: i32, %arg1: i32) -> (i32, i32) {
    %c0_i32 = arith.constant 0 : i32
    %c0_i32_0 = arith.constant 0 : i32
    return %c0_i32, %arg0 : i32, i32
  }
  func.func @transform_3(%arg0: i32, %arg1: i32) -> (i32, i32) {
    %c0_i32 = arith.constant 0 : i32
    return %arg1, %arg0 : i32, i32
  }
  func.func @transform_4(%arg0: i32, %arg1: i32) -> (i32, i32) {
    %c0_i32 = arith.constant 0 : i32
    return %arg1, %arg0 : i32, i32
  }
}

</mosaic_0001>

<bundles_post_ra>
// kernel: tpu_custom_call.1
= control target key start
LH: loop header
LB: loop body
LE: loop exit
PB: predicated region body
PF: predicated region fallthrough
CT: control target
= control target key end

     0   :  { %10 = vsyncpa [#allocation3], 0  ;;  %s386_s0 = inlined_call_operand.hbm [shape: f32[8,16], index: 0, kind: input, shape index: {}]   ;;  %s387_s1 = inlined_call_operand.hbm [shape: bf16[16,128], index: 1, kind: input, shape index: {}]   ;;  %s388_s2 = inlined_call_operand.vmem [shape: f32[1,128], index: 2, kind: input, shape index: {}]   ;;  %s389_s3 = inlined_call_operand.hbm [shape: f32[8,32], index: 3, kind: output, shape index: {0}]   ;;  %s390_s4 = inlined_call_operand.hbm [shape: f32[8,32], index: 4, kind: output, shape index: {1}]  }
   0x1   :  { %11 = vsyncpa [#allocation6], 0 }
   0x2   :  { %12 = vsyncpa [#allocation4], 0 }
   0x3   :  { %13 = vsyncpa [#allocation9], 0  ;;  %s287_s15 = smov [#allocation2]   ;;  %s288_s17 = smov [#allocation5]  }
   0x4   :  { %s20_s16 = sshll.u32 %s287_s15, 4  ;;  %s29_s18 = sshll.u32 %s288_s17, 4  ;;  %s21_s16 = int_to_ptr.vmem [resolvable:$true] %s20_s16  ;;  %s322_s18 = int_to_ptr.vmem [resolvable:$true] %s29_s18 }
   0x5   :  { %s191_s21 = scalar_lea.hbm %s386_s0, 128 }
   0x6   :  { %p192_p0 = scmp.ne.s32.totalorder %s386_s0, %s191_s21  ;;  %p195_p1 = scmp.lt.u32.totalorder %s191_s21, %s386_s0 }
   0x8   :  { %p197_p2 = pnand %p195_p1, %p192_p0 }
   0xa   :  { %200 = shalt.err (!%p197_p2)
}
   0xb   :  { %s201_s26 = scalar_lea.vmem %s21_s16, 128  ;;  %p206_p4 = scmp.lt.s32.totalorder %s21_s16, %s21_s16 }
   0xc   :  { %p202_p3 = scmp.ne.s32.totalorder %s21_s16, %s201_s26  ;;  %p207_p5 = scmp.lt.s32.totalorder %s201_s26, %s201_s26 }
   0xe   :  { %p208_p6 = por %p207_p5, %p206_p4 }
  0x10   :  { %p209_p7 = pnand %p208_p6, %p202_p3 }
  0x12   :  { %212 = shalt.err (!%p209_p7)
}
  0x13   :  { %23 = dma.hbm_to_vmem [thread:$0]  %s386_s0, 128, %s21_s16, [#allocation3]  }
  0x14   :  { %s213_s5 = scalar_lea.hbm %s387_s1, 128 }
  0x15   :  { %p214_p8 = scmp.ne.s32.totalorder %s387_s1, %s213_s5  ;;  %p217_p9 = scmp.lt.u32.totalorder %s213_s5, %s387_s1 }
  0x17   :  { %p219_p10 = pnand %p217_p9, %p214_p8 }
  0x19   :  { %222 = shalt.err (!%p219_p10)
}
  0x1a   :  { %s223_s10 = scalar_lea.vmem %s322_s18, 128  ;;  %p228_p12 = scmp.lt.s32.totalorder %s322_s18, %s322_s18 }
  0x1b   :  { %p224_p11 = scmp.ne.s32.totalorder %s322_s18, %s223_s10  ;;  %p229_p13 = scmp.lt.s32.totalorder %s223_s10, %s223_s10 }
  0x1d   :  { %p230_p0 = por %p229_p13, %p228_p12 }
  0x1f   :  { %p231_p1 = pnand %p230_p0, %p224_p11 }
  0x21   :  { %234 = shalt.err (!%p231_p1)
}
  0x22   :  { %s289_s0 = smov 64   ;;  %s290_s11 = smov 4  }
  0x23   :  { %35 = dma.hbm_to_vmem [thread:$0]  %s387_s1, 128, %s322_s18, [#allocation6], %s289_s0, %s289_s0, %s290_s11  }
  0x24   :  { %279 = dma.done.wait [#allocation3], 128  }
  0x25   :  { %280 = vsyncadd [#allocation3], 4294967168 }
  0x26   :  { %281 = dma.done.wait [#allocation6], 128  }
  0x27   :  { %282 = vsyncadd [#allocation6], 4294967168  ;;  %v291_v0 = vmov 0.0   ;;  %vm292_vm0 = vmmov 0   ;;  %v184_v1 = vld [vmem:[#allocation5] sm:$0xff]   ;;  %v45_v2 = vld [vmem:[#allocation2] sm:$0xff] }
  0x28   :  { %168 = vmatprep.subr.bf16.mxu0 %v291_v0  ;;  %170 = vmatprep.mubr.msk.bf16.mxu0 %vm292_vm0, %v291_v0  ;;  %v46_v3 = vpack.c.bf16 %v45_v2, %v45_v2  ;;  %vm62_vm1 = vcmask 130048   ;;  %v163_v4 = vld [vmem:[%s388_s2] ss:$0 sm:$0xff]  ;;  %s293_s1 = smov 32   ;;  %s294_s2 = smov 96   ;;  %vm126_vm2 = vcmask 261120  }
  0x29   :  { %169 = vmatpush3.bf16.msra.mxu0 %v184_v1  ;;  %s295_s16 = smov [#allocation7]   ;;  %s296_s18 = smov [#allocation8]  }
  0x2a   :  { %s139_s17 = sshll.u32 %s295_s16, 4  ;;  %s149_s19 = sshll.u32 %s296_s18, 4  ;;  %s140_s17 = int_to_ptr.vmem [resolvable:$true] %s139_s17  ;;  %s150_s19 = int_to_ptr.vmem [resolvable:$true] %s149_s19 }
  0x2b   :  { %s235_s20 = scalar_lea.vmem %s140_s17, 128  ;;  %p240_p3 = scmp.lt.s32.totalorder %s140_s17, %s140_s17 }
  0x2c   :  { %171 = vmatmul.mubr.msk.bf16.vlgmr.msra.gmra.mrb[0].mxu0 %vm62_vm1, %v46_v3  ;;  %p236_p2 = scmp.ne.s32.totalorder %s140_s17, %s235_s20  ;;  %p241_p4 = scmp.lt.s32.totalorder %s235_s20, %s235_s20 }
  0x2e   :  { %p242_p5 = por %p241_p4, %p240_p3 }
  0x30   :  { %p243_p6 = pnand %p242_p5, %p236_p2 }
  0xff   :  { %v100_v5 = vpop.f32.mrb[0].mxu0 }
 0x100   :  { %v101_v6 = vadd.f32 %v163_v4, %v100_v5  ;;  %v172_v7 = vpop.f32.mrb[1].mxu0 }
 0x101   :  { %v103_v8 = vpop.f32.mrb[2].mxu0 }
 0x102   :  { %v173_v9 = vpop.f32.mrb[3].mxu0  ;;  %185 = vtanh.f32 %v101_v6  ;;  %v106_v11 = vmul.f32 0.5, %v101_v6 }
 0x104   :  { %187 = vtanh.f32 %v106_v11 }
 0x10c   :  { %v186_v10 = vpop.eup %185 }
 0x10d   :  { %112 = vrot.lane.b32.xlu0 %v186_v10, %s289_s0 }
 0x10e   :  { %v188_v12 = vpop.eup %187 }
 0x10f   :  { %v108_v13 = vmul.f32 0.5, %v188_v12 }
 0x111   :  { %v109_v14 = vadd.f32 0.5, %v108_v13 }
 0x17f   :  { %v113_v15 = vpop.permute.xlu0 %112 }
 0x180   :  { %v115_v16 = vadd.f32 %v113_v15, %v109_v14 }
 0x182   :  { %189 = vtanh.f32 %v115_v16 }
 0x18c   :  { %v190_v17 = vpop.eup %189 }
 0x18d   :  { %118 = vrot.lane.b32.xlu0 %v190_v17, %s293_s1 }
 0x1ff   :  { %v119_v18 = vpop.permute.xlu0 %118 }
 0x200   :  { %v121_v19 = vmul.f32 %v119_v18, %v109_v14 }
 0x202   :  { %123 = vrot.lane.b32.xlu1 %v121_v19, %s289_s0 }
 0x206   :  { %129 = vrot.lane.b32.xlu1 %v115_v16, %s294_s2 }
 0x274   :  { %v124_v20 = vpop.permute.xlu1 %123 }
 0x275   :  { %127 = vst.msk [vmem:[#allocation7] sm:$0xff] %vm126_vm2, %v124_v20 }
 0x276   :  { %246 = shalt.err (!%p243_p6)
}
 0x277   :  { %s247_s23 = scalar_lea.hbm %s389_s3, 128 }
 0x278   :  { %p248_p7 = scmp.ne.s32.totalorder %s389_s3, %s247_s23  ;;  %p251_p8 = scmp.lt.u32.totalorder %s247_s23, %s389_s3 }
 0x27a   :  { %p253_p9 = pnand %p251_p8, %p248_p7 }
 0x27c   :  { %256 = shalt.err (!%p253_p9)
}
 0x27d   :  { %142 = dma.vmem_to_hbm [thread:$0]  %s140_s17, 128, %s389_s3, [#allocation4]   ;;  %v130_v21 = vpop.permute.xlu1 %129 }
 0x27e   :  { %132 = vst.msk [vmem:[#allocation8] sm:$0xff] %vm126_vm2, %v130_v21  ;;  %s257_s30 = scalar_lea.vmem %s150_s19, 128  ;;  %p262_p11 = scmp.lt.s32.totalorder %s150_s19, %s150_s19 }
 0x27f   :  { %p258_p10 = scmp.ne.s32.totalorder %s150_s19, %s257_s30  ;;  %p263_p12 = scmp.lt.s32.totalorder %s257_s30, %s257_s30 }
 0x281   :  { %p264_p13 = por %p263_p12, %p262_p11 }
 0x283   :  { %p265_p0 = pnand %p264_p13, %p258_p10 }
 0x285   :  { %268 = shalt.err (!%p265_p0)
}
 0x286   :  { %s269_s7 = scalar_lea.hbm %s390_s4, 128 }
 0x287   :  { %p270_p1 = scmp.ne.s32.totalorder %s390_s4, %s269_s7  ;;  %p273_p2 = scmp.lt.u32.totalorder %s269_s7, %s390_s4 }
 0x289   :  { %p275_p3 = pnand %p273_p2, %p270_p1 }
 0x28b   :  { %278 = shalt.err (!%p275_p3)
}
 0x28c   :  { %152 = dma.vmem_to_hbm [thread:$0]  %s150_s19, 128, %s390_s4, [#allocation9]  }
 0x28d   :  { %283 = dma.done.wait [#allocation4], 128  }
 0x28e   :  { %284 = vsyncadd [#allocation4], 4294967168 }
 0x28f   :  { %285 = dma.done.wait [#allocation9], 128  }
 0x290   :  { %286 = vsyncadd [#allocation9], 4294967168 }
 0x291   :  { %159 = vsyncpa [#allocation3], 1 }
 0x292   :  { %160 = vsyncpa [#allocation6], 1 }
 0x293   :  { %161 = vsyncpa [#allocation4], 1 }
 0x294   :  { %162 = vsyncpa [#allocation9], 1 }

</bundles_post_ra>
